<compile_context>
chip_gen: v7x
topology: tpu7x:2x2x1
jax: 0.10.0
libtpu: 0.0.40
codegen_flags: <defaults>
</compile_context>

<pallas_src>
import jax
import jax.numpy as jnp
from jax.experimental import pallas as pl
from jax.experimental.pallas import tpu as pltpu


# ----------------------------------------------------------------------------
# Kernel: full GRU recurrence (hidden path) + Linear(H,3) + Sigmoid
# ----------------------------------------------------------------------------
def gru_encoder_kernel(
    xp_ref,      # (T*B, 3H) f32 : x @ [W_ir|W_iz|W_in] + [b_ir|b_iz|b_in], rows = t*B + b
    h0_ref,      # (B, H)        : initial hidden state
    w_h_ref,     # (H, 3H)       : fused hidden weights [W_hr|W_hz|W_hn] (transposed)
    b_h_ref,     # (1, 3H)       : fused hidden biases  [b_hr|b_hz|b_hn]
    w_lin_ref,   # (H, 3)        : Linear weight (transposed)
    b_lin_ref,   # (1, 3)        : Linear bias
    out_ref,     # (B, 3)        : sigmoid(Linear(h_T))
):
    B, H = h0_ref.shape
    G3 = w_h_ref.shape[1]            # 3H
    T = xp_ref.shape[0] // B

    h = h0_ref[...].astype(jnp.float32)
    w_h = w_h_ref[...]
    # Hoisted: broadcast hidden biases to (B, 3H) once, not once per step.
    b_h = jnp.broadcast_to(b_h_ref[...], (B, G3)).astype(jnp.float32)

    # Fully-unrolled recurrence: ONE MXU matmul + gate elementwise per step.
    for t in range(T):
        xp_t = xp_ref[t * B:(t + 1) * B, :]                                # (B, 3H)
        hp = jnp.dot(h, w_h, preferred_element_type=jnp.float32) + b_h     # (B, 3H)
        r = jax.nn.sigmoid(xp_t[:, 0:H] + hp[:, 0:H])
        z = jax.nn.sigmoid(xp_t[:, H:2 * H] + hp[:, H:2 * H])
        n = jnp.tanh(xp_t[:, 2 * H:] + r * hp[:, 2 * H:])
        h = (1.0 - z) * n + z * h

    # Linear(H -> 3) + Sigmoid on the final hidden state.
    y = jnp.dot(h, w_lin_ref[...], preferred_element_type=jnp.float32) + b_lin_ref[...]
    out_ref[...] = jax.nn.sigmoid(y).astype(out_ref.dtype)


# ----------------------------------------------------------------------------
# Wrapper
# ----------------------------------------------------------------------------
@jax.jit
def encoder_forward(x_bti, h0_1bh, params):
    """x_bti: (B, T, I) batch_first like PyTorch; h0: (1, B, H). Returns (1, B, 3)."""
    B, T, _ = x_bti.shape
    H = h0_1bh.shape[-1]

    # Hoisted input projection for ALL T steps as one matmul; einsum fuses the
    # batch-first -> time-major transpose.  Input biases folded in here.
    x_proj = jnp.einsum('bti,ig->tbg', x_bti.astype(jnp.float32), params["w_i"])
    x_proj = x_proj.reshape(T * B, 3 * H) + params["b_i"]        # rows = t*B + b

    h0 = h0_1bh[0]                                               # (B, H)
    vmem = pl.BlockSpec(memory_space=pltpu.MemorySpace.VMEM)

    out = pl.pallas_call(
        gru_encoder_kernel,
        out_shape=jax.ShapeDtypeStruct((B, 3), jnp.float32),
        in_specs=[vmem] * 6,
        out_specs=vmem,
    )(x_proj, h0, params["w_h"], params["b_h"], params["w_lin"], params["b_lin"])
    return out[None, :, :]                                       # (1, B, 3)


# ----------------------------------------------------------------------------
# Pure-JAX reference (mirrors torch.nn.GRU + Linear + Sigmoid) for verification
# ----------------------------------------------------------------------------
def encoder_reference(x_bti, h0_1bh, params):
    B, T, _ = x_bti.shape
    H = h0_1bh.shape[-1]
    w_i, w_h = params["w_i"], params["w_h"]
    b_i, b_h = params["b_i"], params["b_h"]
    h = h0_1bh[0].astype(jnp.float32)
    for t in range(T):
        x_t = x_bti[:, t, :]
        xp = x_t @ w_i + b_i
        hp = h @ w_h + b_h
        r = jax.nn.sigmoid(xp[:, :H] + hp[:, :H])
        z = jax.nn.sigmoid(xp[:, H:2 * H] + hp[:, H:2 * H])
        n = jnp.tanh(xp[:, 2 * H:] + r * hp[:, 2 * H:])
        h = (1.0 - z) * n + z * h
    y = jax.nn.sigmoid(h @ params["w_lin"] + params["b_lin"])
    return y[None, :, :]


# ----------------------------------------------------------------------------
# Deterministic parameter init (PyTorch scheme: U(-1/sqrt(H), 1/sqrt(H))),
# stored transposed as (in_dim, out_dim) and gate-fused along the lane axis.
# ----------------------------------------------------------------------------
def init_params(key, input_size, hidden_size):
    I, H = input_size, hidden_size
    k = 1.0 / jnp.sqrt(H)
    keys = jax.random.split(key, 14)

    def u(kk, shape):
        return jax.random.uniform(kk, shape, jnp.float32, -k, k)

    w_ir, w_iz, w_in = (u(keys[i], (I, H)) for i in range(3))
    w_hr, w_hz, w_hn = (u(keys[3 + i], (H, H)) for i in range(3))
    b_ir, b_iz, b_in_ = (u(keys[6 + i], (1, H)) for i in range(3))
    b_hr, b_hz, b_hn = (u(keys[9 + i], (1, H)) for i in range(3))
    w_lin = u(keys[12], (H, 3))
    b_lin = u(keys[13], (1, 3))

    return dict(
        w_i=jnp.concatenate([w_ir, w_iz, w_in], axis=1),    # (I, 3H)
        w_h=jnp.concatenate([w_hr, w_hz, w_hn], axis=1),    # (H, 3H)
        b_i=jnp.concatenate([b_ir, b_iz, b_in_], axis=1),   # (1, 3H)
        b_h=jnp.concatenate([b_hr, b_hz, b_hn], axis=1),    # (1, 3H)
        w_lin=w_lin, b_lin=b_lin,
    )


# TODO(synk): only the 'gru' branch of Encoder is implemented; the 'lstm'
# branch with use_linear=True is unrunnable in the original PyTorch (tuple item
# assignment on the (h, c) tuple); 'rnn' would follow the same kernel structure.

if __name__ == "__main__":
    # Small shapes consistent with the module: batch=2, seq=8, input_size=4, hidden=32
    B, T, INPUT_SIZE, HIDDEN_SIZE = 2, 8, 4, 32

    root = jax.random.PRNGKey(0)
    k_params, k_x, k_h = jax.random.split(root, 3)

    params = init_params(k_params, INPUT_SIZE, HIDDEN_SIZE)
    x = jax.random.normal(k_x, (B, T, INPUT_SIZE), jnp.float32)        # batch_first
    h0 = jax.random.normal(k_h, (1, B, HIDDEN_SIZE), jnp.float32)      # (num_layers, B, H)

    out = jax.block_until_ready(encoder_forward(x, h0, params))
    ref = encoder_reference(x, h0, params)

    assert out.shape == (1, B, 3), out.shape
    assert jnp.allclose(out, ref, rtol=5e-3, atol=5e-3), (
        f"max abs diff {jnp.max(jnp.abs(out - ref))}")

    print("KERNEL_OK")
</pallas_src>

<mosaic_0001>
module attributes {stable_mosaic.version = 11 : i64} {
  func.func @gru_encoder_kernel(%arg0: memref<16x96xf32, #tpu.memory_space<vmem>>, %arg1: memref<2x32xf32, #tpu.memory_space<vmem>>, %arg2: memref<32x96xf32, #tpu.memory_space<vmem>>, %arg3: memref<1x96xf32, #tpu.memory_space<vmem>>, %arg4: memref<32x3xf32, #tpu.memory_space<vmem>>, %arg5: memref<1x3xf32, #tpu.memory_space<vmem>>, %arg6: memref<2x3xf32, #tpu.memory_space<vmem>>) attributes {dimension_semantics = [], scalar_prefetch = 0 : i64, scratch_operands = 0 : i64, tpu.core_type = #tpu.core_type<tc>} {
    %c0 = arith.constant 0 : index
    %c0_0 = arith.constant 0 : index
    %0 = vector.load %arg1[%c0, %c0_0] : memref<2x32xf32, #tpu.memory_space<vmem>>, vector<2x32xf32>
    %c0_1 = arith.constant 0 : index
    %c0_2 = arith.constant 0 : index
    %1 = vector.load %arg2[%c0_1, %c0_2] : memref<32x96xf32, #tpu.memory_space<vmem>>, vector<32x96xf32>
    %c0_3 = arith.constant 0 : index
    %c0_4 = arith.constant 0 : index
    %2 = vector.load %arg3[%c0_3, %c0_4] : memref<1x96xf32, #tpu.memory_space<vmem>>, vector<1x96xf32>
    %3 = vector.shape_cast %2 : vector<1x96xf32> to vector<1x96xf32>
    %4 = vector.broadcast %3 : vector<1x96xf32> to vector<2x96xf32>
    %c0_5 = arith.constant 0 : index
    %c0_6 = arith.constant 0 : index
    %5 = vector.load %arg0[%c0_5, %c0_6] : memref<16x96xf32, #tpu.memory_space<vmem>>, vector<2x96xf32>
    %cst = arith.constant dense<0.000000e+00> : vector<2x96xf32>
    %6 = tpu.matmul %0, %1, %cst {dimension_numbers = #tpu.dot_dimension_numbers<[1], [0], [0], [1], [0, 0, 1, 1], [], []>} : vector<2x32xf32>, vector<32x96xf32>, vector<2x96xf32> -> vector<2x96xf32>
    %7 = arith.addf %6, %4 : vector<2x96xf32>
    %8 = vector.extract_strided_slice %5 {offsets = [0, 0], sizes = [2, 32], strides = [1, 1]} : vector<2x96xf32> to vector<2x32xf32>
    %9 = vector.extract_strided_slice %7 {offsets = [0, 0], sizes = [2, 32], strides = [1, 1]} : vector<2x96xf32> to vector<2x32xf32>
    %10 = arith.addf %8, %9 : vector<2x32xf32>
    %11 = arith.negf %10 : vector<2x32xf32>
    %12 = math.exp %11 : vector<2x32xf32>
    %cst_7 = arith.constant 1.000000e+00 : f32
    %13 = vector.broadcast %cst_7 : f32 to vector<2x32xf32>
    %14 = arith.addf %13, %12 : vector<2x32xf32>
    %15 = arith.divf %13, %14 : vector<2x32xf32>
    %16 = vector.extract_strided_slice %5 {offsets = [0, 32], sizes = [2, 32], strides = [1, 1]} : vector<2x96xf32> to vector<2x32xf32>
    %17 = vector.extract_strided_slice %7 {offsets = [0, 32], sizes = [2, 32], strides = [1, 1]} : vector<2x96xf32> to vector<2x32xf32>
    %18 = arith.addf %16, %17 : vector<2x32xf32>
    %19 = arith.negf %18 : vector<2x32xf32>
    %20 = math.exp %19 : vector<2x32xf32>
    %cst_8 = arith.constant 1.000000e+00 : f32
    %21 = vector.broadcast %cst_8 : f32 to vector<2x32xf32>
    %22 = arith.addf %21, %20 : vector<2x32xf32>
    %23 = arith.divf %21, %22 : vector<2x32xf32>
    %24 = vector.extract_strided_slice %5 {offsets = [0, 64], sizes = [2, 32], strides = [1, 1]} : vector<2x96xf32> to vector<2x32xf32>
    %25 = vector.extract_strided_slice %7 {offsets = [0, 64], sizes = [2, 32], strides = [1, 1]} : vector<2x96xf32> to vector<2x32xf32>
    %26 = arith.mulf %15, %25 : vector<2x32xf32>
    %27 = arith.addf %24, %26 : vector<2x32xf32>
    %28 = math.tanh %27 : vector<2x32xf32>
    %cst_9 = arith.constant 1.000000e+00 : f32
    %29 = vector.broadcast %cst_9 : f32 to vector<2x32xf32>
    %30 = arith.subf %29, %23 : vector<2x32xf32>
    %31 = arith.mulf %30, %28 : vector<2x32xf32>
    %32 = arith.mulf %23, %0 : vector<2x32xf32>
    %33 = arith.addf %31, %32 : vector<2x32xf32>
    %c2 = arith.constant 2 : index
    %c0_10 = arith.constant 0 : index
    %34 = vector.load %arg0[%c2, %c0_10] : memref<16x96xf32, #tpu.memory_space<vmem>>, vector<2x96xf32>
    %cst_11 = arith.constant dense<0.000000e+00> : vector<2x96xf32>
    %35 = tpu.matmul %33, %1, %cst_11 {dimension_numbers = #tpu.dot_dimension_numbers<[1], [0], [0], [1], [0, 0, 1, 1], [], []>} : vector<2x32xf32>, vector<32x96xf32>, vector<2x96xf32> -> vector<2x96xf32>
    %36 = arith.addf %35, %4 : vector<2x96xf32>
    %37 = vector.extract_strided_slice %34 {offsets = [0, 0], sizes = [2, 32], strides = [1, 1]} : vector<2x96xf32> to vector<2x32xf32>
    %38 = vector.extract_strided_slice %36 {offsets = [0, 0], sizes = [2, 32], strides = [1, 1]} : vector<2x96xf32> to vector<2x32xf32>
    %39 = arith.addf %37, %38 : vector<2x32xf32>
    %40 = arith.negf %39 : vector<2x32xf32>
    %41 = math.exp %40 : vector<2x32xf32>
    %cst_12 = arith.constant 1.000000e+00 : f32
    %42 = vector.broadcast %cst_12 : f32 to vector<2x32xf32>
    %43 = arith.addf %42, %41 : vector<2x32xf32>
    %44 = arith.divf %42, %43 : vector<2x32xf32>
    %45 = vector.extract_strided_slice %34 {offsets = [0, 32], sizes = [2, 32], strides = [1, 1]} : vector<2x96xf32> to vector<2x32xf32>
    %46 = vector.extract_strided_slice %36 {offsets = [0, 32], sizes = [2, 32], strides = [1, 1]} : vector<2x96xf32> to vector<2x32xf32>
    %47 = arith.addf %45, %46 : vector<2x32xf32>
    %48 = arith.negf %47 : vector<2x32xf32>
    %49 = math.exp %48 : vector<2x32xf32>
    %cst_13 = arith.constant 1.000000e+00 : f32
    %50 = vector.broadcast %cst_13 : f32 to vector<2x32xf32>
    %51 = arith.addf %50, %49 : vector<2x32xf32>
    %52 = arith.divf %50, %51 : vector<2x32xf32>
    %53 = vector.extract_strided_slice %34 {offsets = [0, 64], sizes = [2, 32], strides = [1, 1]} : vector<2x96xf32> to vector<2x32xf32>
    %54 = vector.extract_strided_slice %36 {offsets = [0, 64], sizes = [2, 32], strides = [1, 1]} : vector<2x96xf32> to vector<2x32xf32>
    %55 = arith.mulf %44, %54 : vector<2x32xf32>
    %56 = arith.addf %53, %55 : vector<2x32xf32>
    %57 = math.tanh %56 : vector<2x32xf32>
    %cst_14 = arith.constant 1.000000e+00 : f32
    %58 = vector.broadcast %cst_14 : f32 to vector<2x32xf32>
    %59 = arith.subf %58, %52 : vector<2x32xf32>
    %60 = arith.mulf %59, %57 : vector<2x32xf32>
    %61 = arith.mulf %52, %33 : vector<2x32xf32>
    %62 = arith.addf %60, %61 : vector<2x32xf32>
    %c4 = arith.constant 4 : index
    %c0_15 = arith.constant 0 : index
    %63 = vector.load %arg0[%c4, %c0_15] : memref<16x96xf32, #tpu.memory_space<vmem>>, vector<2x96xf32>
    %cst_16 = arith.constant dense<0.000000e+00> : vector<2x96xf32>
    %64 = tpu.matmul %62, %1, %cst_16 {dimension_numbers = #tpu.dot_dimension_numbers<[1], [0], [0], [1], [0, 0, 1, 1], [], []>} : vector<2x32xf32>, vector<32x96xf32>, vector<2x96xf32> -> vector<2x96xf32>
    %65 = arith.addf %64, %4 : vector<2x96xf32>
    %66 = vector.extract_strided_slice %63 {offsets = [0, 0], sizes = [2, 32], strides = [1, 1]} : vector<2x96xf32> to vector<2x32xf32>
    %67 = vector.extract_strided_slice %65 {offsets = [0, 0], sizes = [2, 32], strides = [1, 1]} : vector<2x96xf32> to vector<2x32xf32>
    %68 = arith.addf %66, %67 : vector<2x32xf32>
    %69 = arith.negf %68 : vector<2x32xf32>
    %70 = math.exp %69 : vector<2x32xf32>
    %cst_17 = arith.constant 1.000000e+00 : f32
    %71 = vector.broadcast %cst_17 : f32 to vector<2x32xf32>
    %72 = arith.addf %71, %70 : vector<2x32xf32>
    %73 = arith.divf %71, %72 : vector<2x32xf32>
    %74 = vector.extract_strided_slice %63 {offsets = [0, 32], sizes = [2, 32], strides = [1, 1]} : vector<2x96xf32> to vector<2x32xf32>
    %75 = vector.extract_strided_slice %65 {offsets = [0, 32], sizes = [2, 32], strides = [1, 1]} : vector<2x96xf32> to vector<2x32xf32>
    %76 = arith.addf %74, %75 : vector<2x32xf32>
    %77 = arith.negf %76 : vector<2x32xf32>
    %78 = math.exp %77 : vector<2x32xf32>
    %cst_18 = arith.constant 1.000000e+00 : f32
    %79 = vector.broadcast %cst_18 : f32 to vector<2x32xf32>
    %80 = arith.addf %79, %78 : vector<2x32xf32>
    %81 = arith.divf %79, %80 : vector<2x32xf32>
    %82 = vector.extract_strided_slice %63 {offsets = [0, 64], sizes = [2, 32], strides = [1, 1]} : vector<2x96xf32> to vector<2x32xf32>
    %83 = vector.extract_strided_slice %65 {offsets = [0, 64], sizes = [2, 32], strides = [1, 1]} : vector<2x96xf32> to vector<2x32xf32>
    %84 = arith.mulf %73, %83 : vector<2x32xf32>
    %85 = arith.addf %82, %84 : vector<2x32xf32>
    %86 = math.tanh %85 : vector<2x32xf32>
    %cst_19 = arith.constant 1.000000e+00 : f32
    %87 = vector.broadcast %cst_19 : f32 to vector<2x32xf32>
    %88 = arith.subf %87, %81 : vector<2x32xf32>
    %89 = arith.mulf %88, %86 : vector<2x32xf32>
    %90 = arith.mulf %81, %62 : vector<2x32xf32>
    %91 = arith.addf %89, %90 : vector<2x32xf32>
    %c6 = arith.constant 6 : index
    %c0_20 = arith.constant 0 : index
    %92 = vector.load %arg0[%c6, %c0_20] : memref<16x96xf32, #tpu.memory_space<vmem>>, vector<2x96xf32>
    %cst_21 = arith.constant dense<0.000000e+00> : vector<2x96xf32>
    %93 = tpu.matmul %91, %1, %cst_21 {dimension_numbers = #tpu.dot_dimension_numbers<[1], [0], [0], [1], [0, 0, 1, 1], [], []>} : vector<2x32xf32>, vector<32x96xf32>, vector<2x96xf32> -> vector<2x96xf32>
    %94 = arith.addf %93, %4 : vector<2x96xf32>
    %95 = vector.extract_strided_slice %92 {offsets = [0, 0], sizes = [2, 32], strides = [1, 1]} : vector<2x96xf32> to vector<2x32xf32>
    %96 = vector.extract_strided_slice %94 {offsets = [0, 0], sizes = [2, 32], strides = [1, 1]} : vector<2x96xf32> to vector<2x32xf32>
    %97 = arith.addf %95, %96 : vector<2x32xf32>
    %98 = arith.negf %97 : vector<2x32xf32>
    %99 = math.exp %98 : vector<2x32xf32>
    %cst_22 = arith.constant 1.000000e+00 : f32
    %100 = vector.broadcast %cst_22 : f32 to vector<2x32xf32>
    %101 = arith.addf %100, %99 : vector<2x32xf32>
    %102 = arith.divf %100, %101 : vector<2x32xf32>
    %103 = vector.extract_strided_slice %92 {offsets = [0, 32], sizes = [2, 32], strides = [1, 1]} : vector<2x96xf32> to vector<2x32xf32>
    %104 = vector.extract_strided_slice %94 {offsets = [0, 32], sizes = [2, 32], strides = [1, 1]} : vector<2x96xf32> to vector<2x32xf32>
    %105 = arith.addf %103, %104 : vector<2x32xf32>
    %106 = arith.negf %105 : vector<2x32xf32>
    %107 = math.exp %106 : vector<2x32xf32>
    %cst_23 = arith.constant 1.000000e+00 : f32
    %108 = vector.broadcast %cst_23 : f32 to vector<2x32xf32>
    %109 = arith.addf %108, %107 : vector<2x32xf32>
    %110 = arith.divf %108, %109 : vector<2x32xf32>
    %111 = vector.extract_strided_slice %92 {offsets = [0, 64], sizes = [2, 32], strides = [1, 1]} : vector<2x96xf32> to vector<2x32xf32>
    %112 = vector.extract_strided_slice %94 {offsets = [0, 64], sizes = [2, 32], strides = [1, 1]} : vector<2x96xf32> to vector<2x32xf32>
    %113 = arith.mulf %102, %112 : vector<2x32xf32>
    %114 = arith.addf %111, %113 : vector<2x32xf32>
    %115 = math.tanh %114 : vector<2x32xf32>
    %cst_24 = arith.constant 1.000000e+00 : f32
    %116 = vector.broadcast %cst_24 : f32 to vector<2x32xf32>
    %117 = arith.subf %116, %110 : vector<2x32xf32>
    %118 = arith.mulf %117, %115 : vector<2x32xf32>
    %119 = arith.mulf %110, %91 : vector<2x32xf32>
    %120 = arith.addf %118, %119 : vector<2x32xf32>
    %c8 = arith.constant 8 : index
    %c0_25 = arith.constant 0 : index
    %121 = vector.load %arg0[%c8, %c0_25] : memref<16x96xf32, #tpu.memory_space<vmem>>, vector<2x96xf32>
    %cst_26 = arith.constant dense<0.000000e+00> : vector<2x96xf32>
    %122 = tpu.matmul %120, %1, %cst_26 {dimension_numbers = #tpu.dot_dimension_numbers<[1], [0], [0], [1], [0, 0, 1, 1], [], []>} : vector<2x32xf32>, vector<32x96xf32>, vector<2x96xf32> -> vector<2x96xf32>
    %123 = arith.addf %122, %4 : vector<2x96xf32>
    %124 = vector.extract_strided_slice %121 {offsets = [0, 0], sizes = [2, 32], strides = [1, 1]} : vector<2x96xf32> to vector<2x32xf32>
    %125 = vector.extract_strided_slice %123 {offsets = [0, 0], sizes = [2, 32], strides = [1, 1]} : vector<2x96xf32> to vector<2x32xf32>
    %126 = arith.addf %124, %125 : vector<2x32xf32>
    %127 = arith.negf %126 : vector<2x32xf32>
    %128 = math.exp %127 : vector<2x32xf32>
    %cst_27 = arith.constant 1.000000e+00 : f32
    %129 = vector.broadcast %cst_27 : f32 to vector<2x32xf32>
    %130 = arith.addf %129, %128 : vector<2x32xf32>
    %131 = arith.divf %129, %130 : vector<2x32xf32>
    %132 = vector.extract_strided_slice %121 {offsets = [0, 32], sizes = [2, 32], strides = [1, 1]} : vector<2x96xf32> to vector<2x32xf32>
    %133 = vector.extract_strided_slice %123 {offsets = [0, 32], sizes = [2, 32], strides = [1, 1]} : vector<2x96xf32> to vector<2x32xf32>
    %134 = arith.addf %132, %133 : vector<2x32xf32>
    %135 = arith.negf %134 : vector<2x32xf32>
    %136 = math.exp %135 : vector<2x32xf32>
    %cst_28 = arith.constant 1.000000e+00 : f32
    %137 = vector.broadcast %cst_28 : f32 to vector<2x32xf32>
    %138 = arith.addf %137, %136 : vector<2x32xf32>
    %139 = arith.divf %137, %138 : vector<2x32xf32>
    %140 = vector.extract_strided_slice %121 {offsets = [0, 64], sizes = [2, 32], strides = [1, 1]} : vector<2x96xf32> to vector<2x32xf32>
    %141 = vector.extract_strided_slice %123 {offsets = [0, 64], sizes = [2, 32], strides = [1, 1]} : vector<2x96xf32> to vector<2x32xf32>
    %142 = arith.mulf %131, %141 : vector<2x32xf32>
    %143 = arith.addf %140, %142 : vector<2x32xf32>
    %144 = math.tanh %143 : vector<2x32xf32>
    %cst_29 = arith.constant 1.000000e+00 : f32
    %145 = vector.broadcast %cst_29 : f32 to vector<2x32xf32>
    %146 = arith.subf %145, %139 : vector<2x32xf32>
    %147 = arith.mulf %146, %144 : vector<2x32xf32>
    %148 = arith.mulf %139, %120 : vector<2x32xf32>
    %149 = arith.addf %147, %148 : vector<2x32xf32>
    %c10 = arith.constant 10 : index
    %c0_30 = arith.constant 0 : index
    %150 = vector.load %arg0[%c10, %c0_30] : memref<16x96xf32, #tpu.memory_space<vmem>>, vector<2x96xf32>
    %cst_31 = arith.constant dense<0.000000e+00> : vector<2x96xf32>
    %151 = tpu.matmul %149, %1, %cst_31 {dimension_numbers = #tpu.dot_dimension_numbers<[1], [0], [0], [1], [0, 0, 1, 1], [], []>} : vector<2x32xf32>, vector<32x96xf32>, vector<2x96xf32> -> vector<2x96xf32>
    %152 = arith.addf %151, %4 : vector<2x96xf32>
    %153 = vector.extract_strided_slice %150 {offsets = [0, 0], sizes = [2, 32], strides = [1, 1]} : vector<2x96xf32> to vector<2x32xf32>
    %154 = vector.extract_strided_slice %152 {offsets = [0, 0], sizes = [2, 32], strides = [1, 1]} : vector<2x96xf32> to vector<2x32xf32>
    %155 = arith.addf %153, %154 : vector<2x32xf32>
    %156 = arith.negf %155 : vector<2x32xf32>
    %157 = math.exp %156 : vector<2x32xf32>
    %cst_32 = arith.constant 1.000000e+00 : f32
    %158 = vector.broadcast %cst_32 : f32 to vector<2x32xf32>
    %159 = arith.addf %158, %157 : vector<2x32xf32>
    %160 = arith.divf %158, %159 : vector<2x32xf32>
    %161 = vector.extract_strided_slice %150 {offsets = [0, 32], sizes = [2, 32], strides = [1, 1]} : vector<2x96xf32> to vector<2x32xf32>
    %162 = vector.extract_strided_slice %152 {offsets = [0, 32], sizes = [2, 32], strides = [1, 1]} : vector<2x96xf32> to vector<2x32xf32>
    %163 = arith.addf %161, %162 : vector<2x32xf32>
    %164 = arith.negf %163 : vector<2x32xf32>
    %165 = math.exp %164 : vector<2x32xf32>
    %cst_33 = arith.constant 1.000000e+00 : f32
    %166 = vector.broadcast %cst_33 : f32 to vector<2x32xf32>
    %167 = arith.addf %166, %165 : vector<2x32xf32>
    %168 = arith.divf %166, %167 : vector<2x32xf32>
    %169 = vector.extract_strided_slice %150 {offsets = [0, 64], sizes = [2, 32], strides = [1, 1]} : vector<2x96xf32> to vector<2x32xf32>
    %170 = vector.extract_strided_slice %152 {offsets = [0, 64], sizes = [2, 32], strides = [1, 1]} : vector<2x96xf32> to vector<2x32xf32>
    %171 = arith.mulf %160, %170 : vector<2x32xf32>
    %172 = arith.addf %169, %171 : vector<2x32xf32>
    %173 = math.tanh %172 : vector<2x32xf32>
    %cst_34 = arith.constant 1.000000e+00 : f32
    %174 = vector.broadcast %cst_34 : f32 to vector<2x32xf32>
    %175 = arith.subf %174, %168 : vector<2x32xf32>
    %176 = arith.mulf %175, %173 : vector<2x32xf32>
    %177 = arith.mulf %168, %149 : vector<2x32xf32>
    %178 = arith.addf %176, %177 : vector<2x32xf32>
    %c12 = arith.constant 12 : index
    %c0_35 = arith.constant 0 : index
    %179 = vector.load %arg0[%c12, %c0_35] : memref<16x96xf32, #tpu.memory_space<vmem>>, vector<2x96xf32>
    %cst_36 = arith.constant dense<0.000000e+00> : vector<2x96xf32>
    %180 = tpu.matmul %178, %1, %cst_36 {dimension_numbers = #tpu.dot_dimension_numbers<[1], [0], [0], [1], [0, 0, 1, 1], [], []>} : vector<2x32xf32>, vector<32x96xf32>, vector<2x96xf32> -> vector<2x96xf32>
    %181 = arith.addf %180, %4 : vector<2x96xf32>
    %182 = vector.extract_strided_slice %179 {offsets = [0, 0], sizes = [2, 32], strides = [1, 1]} : vector<2x96xf32> to vector<2x32xf32>
    %183 = vector.extract_strided_slice %181 {offsets = [0, 0], sizes = [2, 32], strides = [1, 1]} : vector<2x96xf32> to vector<2x32xf32>
    %184 = arith.addf %182, %183 : vector<2x32xf32>
    %185 = arith.negf %184 : vector<2x32xf32>
    %186 = math.exp %185 : vector<2x32xf32>
    %cst_37 = arith.constant 1.000000e+00 : f32
    %187 = vector.broadcast %cst_37 : f32 to vector<2x32xf32>
    %188 = arith.addf %187, %186 : vector<2x32xf32>
    %189 = arith.divf %187, %188 : vector<2x32xf32>
    %190 = vector.extract_strided_slice %179 {offsets = [0, 32], sizes = [2, 32], strides = [1, 1]} : vector<2x96xf32> to vector<2x32xf32>
    %191 = vector.extract_strided_slice %181 {offsets = [0, 32], sizes = [2, 32], strides = [1, 1]} : vector<2x96xf32> to vector<2x32xf32>
    %192 = arith.addf %190, %191 : vector<2x32xf32>
    %193 = arith.negf %192 : vector<2x32xf32>
    %194 = math.exp %193 : vector<2x32xf32>
    %cst_38 = arith.constant 1.000000e+00 : f32
    %195 = vector.broadcast %cst_38 : f32 to vector<2x32xf32>
    %196 = arith.addf %195, %194 : vector<2x32xf32>
    %197 = arith.divf %195, %196 : vector<2x32xf32>
    %198 = vector.extract_strided_slice %179 {offsets = [0, 64], sizes = [2, 32], strides = [1, 1]} : vector<2x96xf32> to vector<2x32xf32>
    %199 = vector.extract_strided_slice %181 {offsets = [0, 64], sizes = [2, 32], strides = [1, 1]} : vector<2x96xf32> to vector<2x32xf32>
    %200 = arith.mulf %189, %199 : vector<2x32xf32>
    %201 = arith.addf %198, %200 : vector<2x32xf32>
    %202 = math.tanh %201 : vector<2x32xf32>
    %cst_39 = arith.constant 1.000000e+00 : f32
    %203 = vector.broadcast %cst_39 : f32 to vector<2x32xf32>
    %204 = arith.subf %203, %197 : vector<2x32xf32>
    %205 = arith.mulf %204, %202 : vector<2x32xf32>
    %206 = arith.mulf %197, %178 : vector<2x32xf32>
    %207 = arith.addf %205, %206 : vector<2x32xf32>
    %c14 = arith.constant 14 : index
    %c0_40 = arith.constant 0 : index
    %208 = vector.load %arg0[%c14, %c0_40] : memref<16x96xf32, #tpu.memory_space<vmem>>, vector<2x96xf32>
    %cst_41 = arith.constant dense<0.000000e+00> : vector<2x96xf32>
    %209 = tpu.matmul %207, %1, %cst_41 {dimension_numbers = #tpu.dot_dimension_numbers<[1], [0], [0], [1], [0, 0, 1, 1], [], []>} : vector<2x32xf32>, vector<32x96xf32>, vector<2x96xf32> -> vector<2x96xf32>
    %210 = arith.addf %209, %4 : vector<2x96xf32>
    %211 = vector.extract_strided_slice %208 {offsets = [0, 0], sizes = [2, 32], strides = [1, 1]} : vector<2x96xf32> to vector<2x32xf32>
    %212 = vector.extract_strided_slice %210 {offsets = [0, 0], sizes = [2, 32], strides = [1, 1]} : vector<2x96xf32> to vector<2x32xf32>
    %213 = arith.addf %211, %212 : vector<2x32xf32>
    %214 = arith.negf %213 : vector<2x32xf32>
    %215 = math.exp %214 : vector<2x32xf32>
    %cst_42 = arith.constant 1.000000e+00 : f32
    %216 = vector.broadcast %cst_42 : f32 to vector<2x32xf32>
    %217 = arith.addf %216, %215 : vector<2x32xf32>
    %218 = arith.divf %216, %217 : vector<2x32xf32>
    %219 = vector.extract_strided_slice %208 {offsets = [0, 32], sizes = [2, 32], strides = [1, 1]} : vector<2x96xf32> to vector<2x32xf32>
    %220 = vector.extract_strided_slice %210 {offsets = [0, 32], sizes = [2, 32], strides = [1, 1]} : vector<2x96xf32> to vector<2x32xf32>
    %221 = arith.addf %219, %220 : vector<2x32xf32>
    %222 = arith.negf %221 : vector<2x32xf32>
    %223 = math.exp %222 : vector<2x32xf32>
    %cst_43 = arith.constant 1.000000e+00 : f32
    %224 = vector.broadcast %cst_43 : f32 to vector<2x32xf32>
    %225 = arith.addf %224, %223 : vector<2x32xf32>
    %226 = arith.divf %224, %225 : vector<2x32xf32>
    %227 = vector.extract_strided_slice %208 {offsets = [0, 64], sizes = [2, 32], strides = [1, 1]} : vector<2x96xf32> to vector<2x32xf32>
    %228 = vector.extract_strided_slice %210 {offsets = [0, 64], sizes = [2, 32], strides = [1, 1]} : vector<2x96xf32> to vector<2x32xf32>
    %229 = arith.mulf %218, %228 : vector<2x32xf32>
    %230 = arith.addf %227, %229 : vector<2x32xf32>
    %231 = math.tanh %230 : vector<2x32xf32>
    %cst_44 = arith.constant 1.000000e+00 : f32
    %232 = vector.broadcast %cst_44 : f32 to vector<2x32xf32>
    %233 = arith.subf %232, %226 : vector<2x32xf32>
    %234 = arith.mulf %233, %231 : vector<2x32xf32>
    %235 = arith.mulf %226, %207 : vector<2x32xf32>
    %236 = arith.addf %234, %235 : vector<2x32xf32>
    %c0_45 = arith.constant 0 : index
    %c0_46 = arith.constant 0 : index
    %237 = vector.load %arg4[%c0_45, %c0_46] : memref<32x3xf32, #tpu.memory_space<vmem>>, vector<32x3xf32>
    %cst_47 = arith.constant dense<0.000000e+00> : vector<2x3xf32>
    %238 = tpu.matmul %236, %237, %cst_47 {dimension_numbers = #tpu.dot_dimension_numbers<[1], [0], [0], [1], [0, 0, 1, 1], [], []>} : vector<2x32xf32>, vector<32x3xf32>, vector<2x3xf32> -> vector<2x3xf32>
    %c0_48 = arith.constant 0 : index
    %c0_49 = arith.constant 0 : index
    %239 = vector.load %arg5[%c0_48, %c0_49] : memref<1x3xf32, #tpu.memory_space<vmem>>, vector<1x3xf32>
    %240 = vector.broadcast %239 : vector<1x3xf32> to vector<2x3xf32>
    %241 = arith.addf %238, %240 : vector<2x3xf32>
    %242 = arith.negf %241 : vector<2x3xf32>
    %243 = math.exp %242 : vector<2x3xf32>
    %cst_50 = arith.constant 1.000000e+00 : f32
    %244 = vector.broadcast %cst_50 : f32 to vector<2x3xf32>
    %245 = arith.addf %244, %243 : vector<2x3xf32>
    %246 = arith.divf %244, %245 : vector<2x3xf32>
    %c0_51 = arith.constant 0 : index
    %c0_52 = arith.constant 0 : index
    %247 = vector.load %arg6[%c0_51, %c0_52] : memref<2x3xf32, #tpu.memory_space<vmem>>, vector<2x3xf32>
    tpu.vector_store %arg6[%c0_51, %c0_52], %246 {strides = array<i32>} : memref<2x3xf32, #tpu.memory_space<vmem>>, vector<2x3xf32>,
    return
  }
}

</mosaic_0001>

<bundles_post_ra>
// kernel: encoder_forward.1
= control target key start
LH: loop header
LB: loop body
LE: loop exit
PB: predicated region body
PF: predicated region fallthrough
CT: control target
= control target key end

     0   :  { %v1263_v3 = vmov 0.0|0.0   ;;  %vm1264_vm0 = vmmov 0   ;;  %v1265_v6 = vmov 0.0   ;;  %s1481_s0 = inlined_call_operand.vmem [shape: f32[16,96], index: 0, kind: input, shape index: {}]   ;;  %s1482_s1 = inlined_call_operand.vmem [shape: f32[2,32], index: 1, kind: input, shape index: {}]   ;;  %s1483_s2 = inlined_call_operand.vmem [shape: f32[32,96], index: 2, kind: input, shape index: {}]   ;;  %s1484_s3 = inlined_call_operand.vmem [shape: f32[1,96], index: 3, kind: input, shape index: {}]   ;;  %s1485_s4 = inlined_call_operand.vmem [shape: f32[32,3], index: 4, kind: input, shape index: {}]   ;;  %s1486_s5 = inlined_call_operand.vmem [shape: f32[1,3], index: 5, kind: input, shape index: {}]   ;;  %s1487_s6 = inlined_call_operand.hbm [shape: f32[2,3], index: 6, kind: output, shape index: {}]  }
   0x1   :  { %v25_v0 = vld [vmem:[%s1483_s2] sm:$0xff]  ;;  %v26_v1 = vld [vmem:[%s1483_s2 + $0x8] sm:$0xff]  ;;  %v27_v2 = vld [vmem:[%s1483_s2 + $0x10] sm:$0xff]  ;;  %1126 = vmatprep.subr.bf16.mxu0 %v1263_v3  ;;  %1035 = vmatprep.mubr.msk.f32.mxu0 %vm1264_vm0, %v1265_v6 }
   0x2   :  { %v1315_v4 = vpack.c.bf16 %v26_v1, %v25_v0  ;;  %v28_v5 = vld [vmem:[%s1483_s2 + $0x18] sm:$0xff]  ;;  %1132 = vmatprep.subr.bf16.mxu1 %v1263_v3  ;;  %1046 = vmatprep.mubr.msk.f32.mxu1 %vm1264_vm0, %v1265_v6 }
   0x3   :  { %11 = vsyncpa [#allocation3], 0  ;;  %v1326_v7 = vpack.c.bf16 %v28_v5, %v27_v2  ;;  %v24_v8 = vld [vmem:[%s1482_s1] sm:$0x3]  ;;  %vm37_vm1 = vcmask 261120   ;;  %s1266_s7 = smov 64  }
   0x4   :  { %1128 = vmatpush3.bf16.msra.mxu0 %v1315_v4  ;;  %1134 = vmatpush3.bf16.msra.mxu1 %v1315_v4  ;;  %v1348_v9 = vld [vmem:[%s1484_s3] ss:$0 sm:$0xff]  ;;  %s1267_s3 = smov 96   ;;  %s1268_s10 = smov 32   ;;  %v140_v34 = vld [vmem:[%s1481_s0 + $0x2] sm:$0x3] }
   0x5   :  { %1129 = vmatprep.subr.bf16.mxu0 %v1263_v3  ;;  %1135 = vmatprep.subr.bf16.mxu1 %v1263_v3  ;;  %v36_v13 = vld [vmem:[%s1481_s0] sm:$0x3]  ;;  %v242_v54 = vld [vmem:[%s1481_s0 + $0x4] sm:$0x3]  ;;  %vm946_vm2 = vcmask 17408  }
   0x8   :  { %1131 = vmatpush3.bf16.msra.mxu0 %v1326_v7  ;;  %1137 = vmatpush3.bf16.msra.mxu1 %v1326_v7 }
   0x9   :  { %1138 = vmatprep.subr.bf16.mxu0 %v1263_v3  ;;  %1144 = vmatprep.subr.bf16.mxu1 %v1263_v3 }
   0xb   :  { %1036 = vmatmul.mubr.msk.f32.vlgmr.msra.gmra.mrb[0].mxu0 %vm37_vm1, %v24_v8 }
   0xc   :  { %1140 = vmatpush3.bf16.msra.mxu0 %v1315_v4  ;;  %1057 = vmatprep.mubr.msk.f32.mxu0 %vm1264_vm0, %v1265_v6 }
   0xd   :  { %1141 = vmatprep.subr.bf16.mxu0 %v1263_v3 }
  0x10   :  { %1143 = vmatpush3.bf16.msra.mxu0 %v1326_v7 }
  0x11   :  { %1150 = vmatprep.subr.bf16.mxu0 %v1263_v3 }
  0xde   :  { %v107_v10 = vpop.f32.mrb[0].mxu0 }
  0xdf   :  { %v108_v11 = vadd.f32 %v1348_v9, %v107_v10  ;;  %v1037_v12 = vpop.f32.mrb[1].mxu0 }
  0xe1   :  { %119 = vrot.lane.b32.xlu0 %v108_v11, %s1266_s7  ;;  %v111_v14 = vadd.f32 %v108_v11, %v36_v13 }
  0xe3   :  { %v964_v15 = vmul.f32 -1.442695, %v111_v14 }
  0xe5   :  { %1187 = vpow2.f32 %v964_v15  ;;  %v344_v15 = vld [vmem:[%s1481_s0 + $0x6] sm:$0x3] }
  0xef   :  { %v1188_v16 = vpop.eup %1187 }
  0xf0   :  { %v115_v17 = vadd.f32 1.0, %v1188_v16 }
  0xf2   :  { %1189 = vrcp.f32 %v115_v17 }
  0xfc   :  { %v1190_v18 = vpop.eup %1189 }
  0xfd   :  { %v129_v25 = vsub.f32 1.0, %v1190_v18 }
 0x153   :  { %v120_v19 = vpop.permute.xlu0 %119 }
 0x154   :  { %v122_v20 = vmul.f32 %v1190_v18, %v120_v19 }
 0x156   :  { %124 = vrot.lane.b32.xlu0 %v122_v20, %s1266_s7 }
 0x1c8   :  { %v125_v21 = vpop.permute.xlu0 %124 }
 0x1c9   :  { %v127_v22 = vadd.f32 %v125_v21, %v36_v13 }
 0x1cb   :  { %1191 = vtanh.f32 %v127_v22 }
 0x1d5   :  { %v1192_v23 = vpop.eup %1191 }
 0x1d6   :  { %131 = vrot.lane.b32.xlu1 %v1192_v23, %s1267_s3 }
 0x1da   :  { %135 = vrot.lane.b32.xlu1 %v24_v8, %s1268_s10 }
 0x248   :  { %v132_v24 = vpop.permute.xlu1 %131 }
 0x249   :  { %v134_v27 = vmul.f32 %v132_v24, %v129_v25 }
 0x24c   :  { %v136_v26 = vpop.permute.xlu1 %135 }
 0x24d   :  { %v138_v28 = vmul.f32 %v1190_v18, %v136_v26 }
 0x24f   :  { %v139_v29 = vadd.f32 %v138_v28, %v134_v27 }
 0x251   :  { %142 = vrot.lane.b32.xlu0 %v139_v29, %s1267_s3 }
 0x2c3   :  { %v143_v30 = vpop.permute.xlu0 %142 }
 0x2c4   :  { %1047 = vmatmul.mubr.msk.f32.vlgmr.msra.gmra.mrb[0].mxu1 %vm37_vm1, %v143_v30 }
 0x2c5   :  { %1146 = vmatpush3.bf16.msra.mxu1 %v1315_v4  ;;  %1068 = vmatprep.mubr.msk.f32.mxu1 %vm1264_vm0, %v1265_v6 }
 0x2c6   :  { %1147 = vmatprep.subr.bf16.mxu1 %v1263_v3 }
 0x2c9   :  { %1149 = vmatpush3.bf16.msra.mxu1 %v1326_v7 }
 0x2ca   :  { %1156 = vmatprep.subr.bf16.mxu1 %v1263_v3 }
 0x397   :  { %v212_v31 = vpop.f32.mrb[0].mxu1 }
 0x398   :  { %v213_v32 = vadd.f32 %v1348_v9, %v212_v31  ;;  %v1048_v33 = vpop.f32.mrb[1].mxu1 }
 0x39a   :  { %224 = vrot.lane.b32.xlu1 %v213_v32, %s1266_s7  ;;  %v216_v35 = vadd.f32 %v213_v32, %v140_v34 }
 0x39c   :  { %v966_v36 = vmul.f32 -1.442695, %v216_v35  ;;  %v446_v35 = vld [vmem:[%s1481_s0 + $0x8] sm:$0x3] }
 0x39e   :  { %1193 = vpow2.f32 %v966_v36 }
 0x3a8   :  { %v1194_v37 = vpop.eup %1193 }
 0x3a9   :  { %v220_v38 = vadd.f32 1.0, %v1194_v37 }
 0x3ab   :  { %1195 = vrcp.f32 %v220_v38 }
 0x3b5   :  { %v1196_v39 = vpop.eup %1195 }
 0x3b6   :  { %v234_v45 = vsub.f32 1.0, %v1196_v39  ;;  %v240_v47 = vmul.f32 %v1196_v39, %v139_v29 }
 0x40c   :  { %v225_v40 = vpop.permute.xlu1 %224 }
 0x40d   :  { %v227_v41 = vmul.f32 %v1196_v39, %v225_v40 }
 0x40f   :  { %229 = vrot.lane.b32.xlu0 %v227_v41, %s1266_s7 }
 0x481   :  { %v230_v42 = vpop.permute.xlu0 %229 }
 0x482   :  { %v232_v43 = vadd.f32 %v230_v42, %v140_v34 }
 0x484   :  { %1197 = vtanh.f32 %v232_v43 }
 0x48e   :  { %v1198_v44 = vpop.eup %1197 }
 0x48f   :  { %236 = vrot.lane.b32.xlu1 %v1198_v44, %s1267_s3 }
 0x501   :  { %v237_v46 = vpop.permute.xlu1 %236 }
 0x502   :  { %v239_v48 = vmul.f32 %v237_v46, %v234_v45 }
 0x504   :  { %v241_v49 = vadd.f32 %v240_v47, %v239_v48 }
 0x506   :  { %244 = vrot.lane.b32.xlu0 %v241_v49, %s1267_s3 }
 0x578   :  { %v245_v50 = vpop.permute.xlu0 %244 }
 0x579   :  { %1058 = vmatmul.mubr.msk.f32.vlgmr.msra.gmra.mrb[2].mxu0 %vm37_vm1, %v245_v50 }
 0x57a   :  { %1152 = vmatpush3.bf16.msra.mxu0 %v1315_v4  ;;  %1079 = vmatprep.mubr.msk.f32.mxu0 %vm1264_vm0, %v1265_v6 }
 0x57b   :  { %1153 = vmatprep.subr.bf16.mxu0 %v1263_v3 }
 0x57e   :  { %1155 = vmatpush3.bf16.msra.mxu0 %v1326_v7 }
 0x57f   :  { %1162 = vmatprep.subr.bf16.mxu0 %v1263_v3 }
 0x64c   :  { %v314_v51 = vpop.f32.mrb[2].mxu0 }
 0x64d   :  { %v315_v52 = vadd.f32 %v1348_v9, %v314_v51  ;;  %v1059_v53 = vpop.f32.mrb[3].mxu0 }
 0x64f   :  { %326 = vrot.lane.b32.xlu1 %v315_v52, %s1266_s7  ;;  %v318_v55 = vadd.f32 %v315_v52, %v242_v54 }
 0x651   :  { %v968_v56 = vmul.f32 -1.442695, %v318_v55  ;;  %v548_v55 = vld [vmem:[%s1481_s0 + $0xa] sm:$0x3] }
 0x653   :  { %1199 = vpow2.f32 %v968_v56 }
 0x65d   :  { %v1200_v57 = vpop.eup %1199 }
 0x65e   :  { %v322_v58 = vadd.f32 1.0, %v1200_v57 }
 0x660   :  { %1201 = vrcp.f32 %v322_v58 }
 0x66a   :  { %v1202_v59 = vpop.eup %1201 }
 0x66b   :  { %v336_v1 = vsub.f32 1.0, %v1202_v59  ;;  %v342_v5 = vmul.f32 %v1202_v59, %v241_v49 }
 0x6c1   :  { %v327_v60 = vpop.permute.xlu1 %326 }
 0x6c2   :  { %v329_v61 = vmul.f32 %v1202_v59, %v327_v60 }
 0x6c4   :  { %331 = vrot.lane.b32.xlu0 %v329_v61, %s1266_s7 }
 0x736   :  { %v332_v62 = vpop.permute.xlu0 %331 }
 0x737   :  { %v334_v63 = vadd.f32 %v332_v62, %v242_v54 }
 0x739   :  { %1203 = vtanh.f32 %v334_v63 }
 0x743   :  { %v1204_v0 = vpop.eup %1203 }
 0x744   :  { %338 = vrot.lane.b32.xlu1 %v1204_v0, %s1267_s3 }
 0x7b6   :  { %v339_v2 = vpop.permute.xlu1 %338 }
 0x7b7   :  { %v341_v8 = vmul.f32 %v339_v2, %v336_v1 }
 0x7b9   :  { %v343_v10 = vadd.f32 %v342_v5, %v341_v8 }
 0x7bb   :  { %346 = vrot.lane.b32.xlu0 %v343_v10, %s1267_s3 }
 0x82d   :  { %v347_v11 = vpop.permute.xlu0 %346 }
 0x82e   :  { %1069 = vmatmul.mubr.msk.f32.vlgmr.msra.gmra.mrb[2].mxu1 %vm37_vm1, %v347_v11 }
 0x82f   :  { %1158 = vmatpush3.bf16.msra.mxu1 %v1315_v4  ;;  %1090 = vmatprep.mubr.msk.f32.mxu1 %vm1264_vm0, %v1265_v6 }
 0x830   :  { %1159 = vmatprep.subr.bf16.mxu1 %v1263_v3 }
 0x833   :  { %1161 = vmatpush3.bf16.msra.mxu1 %v1326_v7 }
 0x834   :  { %1168 = vmatprep.subr.bf16.mxu1 %v1263_v3 }
 0x901   :  { %v416_v12 = vpop.f32.mrb[2].mxu1 }
 0x902   :  { %v417_v13 = vadd.f32 %v1348_v9, %v416_v12  ;;  %v1070_v14 = vpop.f32.mrb[3].mxu1 }
 0x903   :  { %v650_v14 = vld [vmem:[%s1481_s0 + $0xc] sm:$0x3] }
 0x904   :  { %428 = vrot.lane.b32.xlu1 %v417_v13, %s1266_s7  ;;  %v420_v16 = vadd.f32 %v417_v13, %v344_v15 }
 0x906   :  { %v970_v17 = vmul.f32 -1.442695, %v420_v16 }
 0x908   :  { %1205 = vpow2.f32 %v970_v17 }
 0x912   :  { %v1206_v18 = vpop.eup %1205 }
 0x913   :  { %v424_v19 = vadd.f32 1.0, %v1206_v18 }
 0x915   :  { %1207 = vrcp.f32 %v424_v19 }
 0x91f   :  { %v1208_v20 = vpop.eup %1207 }
 0x920   :  { %v438_v26 = vsub.f32 1.0, %v1208_v20  ;;  %v444_v28 = vmul.f32 %v1208_v20, %v343_v10 }
 0x976   :  { %v429_v21 = vpop.permute.xlu1 %428 }
 0x977   :  { %v431_v22 = vmul.f32 %v1208_v20, %v429_v21 }
 0x979   :  { %433 = vrot.lane.b32.xlu0 %v431_v22, %s1266_s7 }
 0x9eb   :  { %v434_v23 = vpop.permute.xlu0 %433 }
 0x9ec   :  { %v436_v24 = vadd.f32 %v434_v23, %v344_v15 }
 0x9ee   :  { %1209 = vtanh.f32 %v436_v24 }
 0x9f8   :  { %v1210_v25 = vpop.eup %1209 }
 0x9f9   :  { %440 = vrot.lane.b32.xlu1 %v1210_v25, %s1267_s3 }
 0xa6b   :  { %v441_v27 = vpop.permute.xlu1 %440 }
 0xa6c   :  { %v443_v29 = vmul.f32 %v441_v27, %v438_v26 }
 0xa6e   :  { %v445_v30 = vadd.f32 %v444_v28, %v443_v29 }
 0xa70   :  { %448 = vrot.lane.b32.xlu0 %v445_v30, %s1267_s3 }
 0xae2   :  { %v449_v31 = vpop.permute.xlu0 %448 }
 0xae3   :  { %1080 = vmatmul.mubr.msk.f32.vlgmr.msra.gmra.mrb[4].mxu0 %vm37_vm1, %v449_v31 }
 0xae4   :  { %1164 = vmatpush3.bf16.msra.mxu0 %v1315_v4  ;;  %1101 = vmatprep.mubr.msk.f32.mxu0 %vm1264_vm0, %v1265_v6 }
 0xae5   :  { %1165 = vmatprep.subr.bf16.mxu0 %v1263_v3 }
 0xae8   :  { %1167 = vmatpush3.bf16.msra.mxu0 %v1326_v7 }
 0xae9   :  { %1174 = vmatprep.subr.bf16.mxu0 %v1263_v3 }
 0xbb6   :  { %v518_v32 = vpop.f32.mrb[4].mxu0 }
 0xbb7   :  { %v519_v33 = vadd.f32 %v1348_v9, %v518_v32  ;;  %v1081_v34 = vpop.f32.mrb[5].mxu0 }
 0xbb9   :  { %530 = vrot.lane.b32.xlu1 %v519_v33, %s1266_s7  ;;  %v522_v36 = vadd.f32 %v519_v33, %v446_v35  ;;  %v752_v33 = vld [vmem:[%s1481_s0 + $0xe] sm:$0x3] }
 0xbbb   :  { %v972_v37 = vmul.f32 -1.442695, %v522_v36 }
 0xbbd   :  { %1211 = vpow2.f32 %v972_v37 }
 0xbc7   :  { %v1212_v38 = vpop.eup %1211 }
 0xbc8   :  { %v526_v39 = vadd.f32 1.0, %v1212_v38 }
 0xbca   :  { %1213 = vrcp.f32 %v526_v39 }
 0xbd4   :  { %v1214_v40 = vpop.eup %1213 }
 0xbd5   :  { %v540_v46 = vsub.f32 1.0, %v1214_v40  ;;  %v546_v48 = vmul.f32 %v1214_v40, %v445_v30 }
 0xc2b   :  { %v531_v41 = vpop.permute.xlu1 %530 }
 0xc2c   :  { %v533_v42 = vmul.f32 %v1214_v40, %v531_v41 }
 0xc2e   :  { %535 = vrot.lane.b32.xlu0 %v533_v42, %s1266_s7  ;;  %v854_v42 = vld [vmem:[%s1485_s4] sm:$0xff] }
 0xca0   :  { %v536_v43 = vpop.permute.xlu0 %535 }
 0xca1   :  { %v538_v44 = vadd.f32 %v536_v43, %v446_v35  ;;  %v855_v43 = vld [vmem:[%s1485_s4 + $0x8] sm:$0xff] }
 0xca3   :  { %1215 = vtanh.f32 %v538_v44  ;;  %v856_v44 = vld [vmem:[%s1485_s4 + $0x10] sm:$0xff] }
 0xcad   :  { %v1216_v45 = vpop.eup %1215 }
 0xcae   :  { %542 = vrot.lane.b32.xlu1 %v1216_v45, %s1267_s3  ;;  %v1175_v45 = vpack.c.bf16 %v855_v43, %v854_v42 }
 0xd20   :  { %v543_v47 = vpop.permute.xlu1 %542 }
 0xd21   :  { %v545_v49 = vmul.f32 %v543_v47, %v540_v46  ;;  %v857_v46 = vld [vmem:[%s1485_s4 + $0x18] sm:$0xff] }
 0xd22   :  { %v1178_v47 = vpack.c.bf16 %v857_v46, %v856_v44 }
 0xd23   :  { %v547_v50 = vadd.f32 %v546_v48, %v545_v49 }
 0xd25   :  { %550 = vrot.lane.b32.xlu0 %v547_v50, %s1267_s3 }
 0xd97   :  { %v551_v51 = vpop.permute.xlu0 %550 }
 0xd98   :  { %1091 = vmatmul.mubr.msk.f32.vlgmr.msra.gmra.mrb[4].mxu1 %vm37_vm1, %v551_v51 }
 0xd99   :  { %1170 = vmatpush3.bf16.msra.mxu1 %v1315_v4  ;;  %1112 = vmatprep.mubr.msk.f32.mxu1 %vm1264_vm0, %v1265_v6 }
 0xd9a   :  { %1171 = vmatprep.subr.bf16.mxu1 %v1263_v3 }
 0xd9d   :  { %1173 = vmatpush3.bf16.msra.mxu1 %v1326_v7 }
 0xe6b   :  { %v620_v52 = vpop.f32.mrb[4].mxu1 }
 0xe6c   :  { %v621_v53 = vadd.f32 %v1348_v9, %v620_v52  ;;  %v1092_v54 = vpop.f32.mrb[5].mxu1 }
 0xe6e   :  { %632 = vrot.lane.b32.xlu1 %v621_v53, %s1266_s7  ;;  %v624_v56 = vadd.f32 %v621_v53, %v548_v55 }
 0xe70   :  { %v974_v57 = vmul.f32 -1.442695, %v624_v56 }
 0xe72   :  { %1217 = vpow2.f32 %v974_v57 }
 0xe7c   :  { %v1218_v4 = vpop.eup %1217 }
 0xe7d   :  { %v628_v58 = vadd.f32 1.0, %v1218_v4 }
 0xe7f   :  { %1219 = vrcp.f32 %v628_v58 }
 0xe89   :  { %v1220_v59 = vpop.eup %1219 }
 0xe8a   :  { %v642_v0 = vsub.f32 1.0, %v1220_v59  ;;  %v648_v2 = vmul.f32 %v1220_v59, %v547_v50 }
 0xee0   :  { %v633_v60 = vpop.permute.xlu1 %632 }
 0xee1   :  { %v635_v61 = vmul.f32 %v1220_v59, %v633_v60 }
 0xee3   :  { %637 = vrot.lane.b32.xlu0 %v635_v61, %s1266_s7 }
 0xf55   :  { %v638_v7 = vpop.permute.xlu0 %637 }
 0xf56   :  { %v640_v62 = vadd.f32 %v638_v7, %v548_v55  ;;  %v979_v55 = vld [vmem:[%s1486_s5] ss:$0 sm:$0xff] }
 0xf58   :  { %1221 = vtanh.f32 %v640_v62 }
 0xf62   :  { %v1222_v63 = vpop.eup %1221 }
 0xf63   :  { %644 = vrot.lane.b32.xlu1 %v1222_v63, %s1267_s3 }
 0xfd5   :  { %v645_v1 = vpop.permute.xlu1 %644 }
 0xfd6   :  { %v647_v5 = vmul.f32 %v645_v1, %v642_v0 }
 0xfd8   :  { %v649_v8 = vadd.f32 %v648_v2, %v647_v5 }
 0xfda   :  { %652 = vrot.lane.b32.xlu0 %v649_v8, %s1267_s3 }
0x104c   :  { %v653_v10 = vpop.permute.xlu0 %652 }
0x104d   :  { %1102 = vmatmul.mubr.msk.f32.vlgmr.msra.gmra.mrb[6].mxu0 %vm37_vm1, %v653_v10 }
0x104e   :  { %1123 = vmatprep.mubr.msk.f32.mxu0 %vm1264_vm0, %v1265_v6  ;;  %1176 = vmatpush3.bf16.msra.mxu0 %v1175_v45 }
0x104f   :  { %1177 = vmatprep.subr.bf16.mxu0 %v1263_v3 }
0x1052   :  { %1179 = vmatpush3.bf16.msra.mxu0 %v1178_v47 }
0x1120   :  { %v722_v11 = vpop.f32.mrb[6].mxu0 }
0x1121   :  { %v723_v12 = vadd.f32 %v1348_v9, %v722_v11  ;;  %v1103_v13 = vpop.f32.mrb[7].mxu0 }
0x1123   :  { %734 = vrot.lane.b32.xlu1 %v723_v12, %s1266_s7  ;;  %v726_v15 = vadd.f32 %v723_v12, %v650_v14 }
0x1125   :  { %v976_v16 = vmul.f32 -1.442695, %v726_v15 }
0x1127   :  { %1223 = vpow2.f32 %v976_v16 }
0x1131   :  { %v1224_v17 = vpop.eup %1223 }
0x1132   :  { %v730_v18 = vadd.f32 1.0, %v1224_v17 }
0x1134   :  { %1225 = vrcp.f32 %v730_v18 }
0x113e   :  { %v1226_v19 = vpop.eup %1225 }
0x113f   :  { %v744_v24 = vsub.f32 1.0, %v1226_v19  ;;  %v750_v26 = vmul.f32 %v1226_v19, %v649_v8 }
0x1195   :  { %v735_v20 = vpop.permute.xlu1 %734 }
0x1196   :  { %v737_v21 = vmul.f32 %v1226_v19, %v735_v20 }
0x1198   :  { %739 = vrot.lane.b32.xlu0 %v737_v21, %s1266_s7 }
0x120a   :  { %v740_v6 = vpop.permute.xlu0 %739 }
0x120b   :  { %v742_v22 = vadd.f32 %v740_v6, %v650_v14 }
0x120d   :  { %1227 = vtanh.f32 %v742_v22 }
0x1217   :  { %v1228_v23 = vpop.eup %1227 }
0x1218   :  { %746 = vrot.lane.b32.xlu1 %v1228_v23, %s1267_s3 }
0x128a   :  { %v747_v25 = vpop.permute.xlu1 %746 }
0x128b   :  { %v749_v27 = vmul.f32 %v747_v25, %v744_v24 }
0x128d   :  { %v751_v28 = vadd.f32 %v750_v26, %v749_v27 }
0x128f   :  { %754 = vrot.lane.b32.xlu0 %v751_v28, %s1267_s3 }
0x1301   :  { %v755_v29 = vpop.permute.xlu0 %754 }
0x1302   :  { %1113 = vmatmul.mubr.msk.f32.vlgmr.msra.gmra.mrb[6].mxu1 %vm37_vm1, %v755_v29 }
0x13d5   :  { %v824_v30 = vpop.f32.mrb[6].mxu1 }
0x13d6   :  { %v825_v31 = vadd.f32 %v1348_v9, %v824_v30  ;;  %v1114_v32 = vpop.f32.mrb[7].mxu1 }
0x13d8   :  { %836 = vrot.lane.b32.xlu1 %v825_v31, %s1266_s7  ;;  %v828_v34 = vadd.f32 %v825_v31, %v752_v33 }
0x13da   :  { %v978_v35 = vmul.f32 -1.442695, %v828_v34 }
0x13dc   :  { %1229 = vpow2.f32 %v978_v35 }
0x13e6   :  { %v1230_v36 = vpop.eup %1229 }
0x13e7   :  { %v832_v37 = vadd.f32 1.0, %v1230_v36 }
0x13e9   :  { %1231 = vrcp.f32 %v832_v37 }
0x13f3   :  { %v1232_v38 = vpop.eup %1231 }
0x13f4   :  { %v846_v49 = vsub.f32 1.0, %v1232_v38  ;;  %v852_v51 = vmul.f32 %v1232_v38, %v751_v28 }
0x144a   :  { %v837_v39 = vpop.permute.xlu1 %836 }
0x144b   :  { %v839_v40 = vmul.f32 %v1232_v38, %v837_v39 }
0x144d   :  { %841 = vrot.lane.b32.xlu0 %v839_v40, %s1266_s7  ;;  %s1269_s7 = smov [#allocation2]  }
0x144e   :  { %s954_s8 = sshll.u32 %s1269_s7, 4  ;;  %s955_s8 = int_to_ptr.vmem [resolvable:$true] %s954_s8 }
0x144f   :  { %s1239_s9 = scalar_lea.vmem %s955_s8, 32  ;;  %p1244_p1 = scmp.lt.s32.totalorder %s955_s8, %s955_s8 }
0x1450   :  { %p1240_p0 = scmp.ne.s32.totalorder %s955_s8, %s1239_s9  ;;  %p1245_p2 = scmp.lt.s32.totalorder %s1239_s9, %s1239_s9 }
0x1452   :  { %p1246_p3 = por %p1245_p2, %p1244_p1 }
0x1454   :  { %p1247_p4 = pnand %p1246_p3, %p1240_p0 }
0x14bf   :  { %v842_v41 = vpop.permute.xlu0 %841 }
0x14c0   :  { %v844_v9 = vadd.f32 %v842_v41, %v752_v33 }
0x14c2   :  { %1233 = vtanh.f32 %v844_v9 }
0x14cc   :  { %v1234_v48 = vpop.eup %1233 }
0x14cd   :  { %848 = vrot.lane.b32.xlu1 %v1234_v48, %s1267_s3 }
0x153f   :  { %v849_v50 = vpop.permute.xlu1 %848 }
0x1540   :  { %v851_v52 = vmul.f32 %v849_v50, %v846_v49 }
0x1542   :  { %v853_v53 = vadd.f32 %v852_v51, %v851_v52 }
0x1544   :  { %866 = vrot.lane.b32.xlu0 %v853_v53, %s1267_s3 }
0x15b6   :  { %v867_v54 = vpop.permute.xlu0 %866 }
0x15b7   :  { %1124 = vmatmul.mubr.msk.f32.vlgmr.msra.gmra.mrb[8].mxu0 %vm37_vm1, %v867_v54 }
0x168a   :  { %v936_v56 = vpop.f32.mrb[8].mxu0 }
0x168b   :  { %v937_v3 = vadd.f32 %v979_v55, %v936_v56  ;;  %v1125_v57 = vpop.f32.mrb[9].mxu0 }
0x168d   :  { %v981_v4 = vmul.f32 -1.442695, %v937_v3 }
0x168f   :  { %1235 = vpow2.f32 %v981_v4 }
0x1699   :  { %v1236_v58 = vpop.eup %1235 }
0x169a   :  { %v943_v59 = vadd.f32 1.0, %v1236_v58 }
0x169c   :  { %1237 = vrcp.f32 %v943_v59 }
0x16a6   :  { %v1238_v60 = vpop.eup %1237 }
0x16a7   :  { %947 = vst.msk [vmem:[#allocation2] sm:$0x3] %vm946_vm2, %v1238_v60 }
0x16a8   :  { %1250 = shalt.err (!%p1247_p4)
}
0x16a9   :  { %s1251_s10 = scalar_lea.hbm %s1487_s6, 32 }
0x16aa   :  { %p1252_p5 = scmp.ne.s32.totalorder %s1487_s6, %s1251_s10  ;;  %p1255_p6 = scmp.lt.u32.totalorder %s1251_s10, %s1487_s6 }
0x16ac   :  { %p1257_p7 = pnand %p1255_p6, %p1252_p5 }
0x16ae   :  { %1260 = shalt.err (!%p1257_p7)
}
0x16af   :  { %957 = dma.vmem_to_hbm [thread:$0]  %s955_s8, 32, %s1487_s6, [#allocation3]  }
0x16b0   :  { %1261 = dma.done.wait [#allocation3], 32  }
0x16b1   :  { %1262 = vsyncadd [#allocation3], 4294967264 }
0x16b2   :  { %961 = vsyncpa [#allocation3], 1 }

</bundles_post_ra>
